<compile_context>
chip_gen: v7x
topology: tpu7x:2x2x1
jax: 0.10.0
libtpu: 0.0.40
codegen_flags: <defaults>
</compile_context>

<pallas_src>
from functools import partial

import jax
import jax.numpy as jnp
from jax import lax
from jax.experimental import pallas as pl
from jax.experimental.pallas import tpu as pltpu

SUBLANE = 8
LANE = 128

TILE_ND_MAX = 256   # max destination-node tile (sublane axis)
TILE_NS = 256       # contraction tile (source nodes); fills v6e/v7x 256-deep MXU
XW_RESIDENT_BYTES = 8 * 1024 * 1024   # keep XW_cat resident in VMEM when <= this


def _round_up(x, m):
    return (x + m - 1) // m * m


def _pick_tile_nd(nd):
    """Dst-node tile: as large as possible but keep >=2 tiles when nd allows
    (axis 0 is the only 'parallel' axis -> keeps both v7x TensorCores busy)."""
    half = _round_up(max(-(-nd // 2), SUBLANE), SUBLANE)
    return min(TILE_ND_MAX, half)


# ---------------------------------------------------------------------------
# Kernels
# ---------------------------------------------------------------------------

def _agg_kernel_resident(a_ref, xw_ref, o_ref):
    """XW_cat resident in VMEM: xw_ref is the full [K_tiles, TILE_NS, Fout_pad] array."""
    k = pl.program_id(1)

    @pl.when(k == 0)
    def _():
        o_ref[...] = jnp.zeros_like(o_ref)

    o_ref[...] += jnp.dot(a_ref[...], xw_ref[k],
                          preferred_element_type=jnp.float32)


def _agg_kernel_stream(a_ref, xw_ref, o_ref):
    """XW streamed per reduction step: xw_ref is one [TILE_NS, Fout_pad] tile."""
    @pl.when(pl.program_id(1) == 0)
    def _():
        o_ref[...] = jnp.zeros_like(o_ref)

    o_ref[...] += jnp.dot(a_ref[...], xw_ref[...],
                          preferred_element_type=jnp.float32)


# ---------------------------------------------------------------------------
# pallas_call wrapper (one call per destination node type)
# ---------------------------------------------------------------------------

@partial(jax.jit, static_argnums=(2, 3, 4))
def _hetero_agg(a_cat, xw_3d, tile_nd, tile_ns, xw_resident):
    """out = A_cat @ XW_cat, tiled; f32 output block used as the accumulator.

    a_cat : [Nd_pad, K_total]               bf16 (D_dst^{-1/2}-scaled adjacency concat)
    xw_3d : [K_total/tile_ns, tile_ns, F]   bf16 (src-normalized transformed feats)
    """
    nd_pad, k_total = a_cat.shape
    k_tiles, _, fout_pad = xw_3d.shape
    grid = (nd_pad // tile_nd, k_tiles)

    a_spec = pl.BlockSpec((tile_nd, tile_ns), lambda i, k: (i, k))
    out_spec = pl.BlockSpec((tile_nd, fout_pad), lambda i, k: (i, 0))

    if xw_resident:
        # Constant block index -> DMA'd once, stays resident across the whole grid.
        xw_spec = pl.BlockSpec((k_tiles, tile_ns, fout_pad), lambda i, k: (0, 0, 0))
        kernel = _agg_kernel_resident
        xw_bytes = xw_3d.size * 2
    else:
        xw_spec = pl.BlockSpec((pl.Squeezed(), tile_ns, fout_pad),
                               lambda i, k: (k, 0, 0))
        kernel = _agg_kernel_stream
        xw_bytes = xw_3d.size * 2 * grid[0]   # re-streamed once per dst tile

    cost = pl.CostEstimate(
        flops=2 * nd_pad * k_total * fout_pad,
        bytes_accessed=int(a_cat.size * 2 + xw_bytes + nd_pad * fout_pad * 4),
        transcendentals=0,
    )

    return pl.pallas_call(
        kernel,
        out_shape=jax.ShapeDtypeStruct((nd_pad, fout_pad), jnp.float32),
        grid_spec=pltpu.PrefetchScalarGridSpec(
            num_scalar_prefetch=0,
            grid=grid,
            in_specs=[a_spec, xw_spec],
            out_specs=out_spec,
        ),
        compiler_params=pltpu.CompilerParams(
            # dst-tile axis shards across TensorCores (v7x megacore);
            # the contraction axis is a sequential reduction.
            dimension_semantics=("parallel", "arbitrary"),
            # Working set: 2x bf16 A tile + resident/streamed bf16 XW + f32 out
            # block; well under 32 MiB on all of v5e / v6e / v7x.
            vmem_limit_bytes=32 * 1024 * 1024,
        ),
        cost_estimate=cost,
    )(a_cat, xw_3d)


# ---------------------------------------------------------------------------
# Per-dst-type preparation (padding, normalization folding, concat over relations)
# ---------------------------------------------------------------------------

def _prepare_dsttype(rels, adjacencies, weights, inputs, tile_ns):
    nd = adjacencies[rels[0][1]].shape[0]
    fout = weights[rels[0][1]].shape[1]
    for _, etype in rels:
        assert adjacencies[etype].shape[0] == nd
        assert weights[etype].shape[1] == fout, "relations into one dst type must share Fout"

    tile_nd = _pick_tile_nd(nd)
    nd_pad = _round_up(nd, tile_nd)
    fout_pad = _round_up(fout, LANE)

    a_blocks, xw_blocks = [], []
    for stype, etype in rels:
        adj = adjacencies[etype].astype(jnp.float32)            # [nd, ns_r] 0/1
        ns_r = adj.shape[1]
        ns_pad_r = _round_up(ns_r, tile_ns)                     # pad per relation only

        # GraphConv norm='both' with allow_zero_in_degree=True: zero degrees are
        # clipped to 1 (their rows/cols are all-zero anyway; clip only avoids inf).
        deg_src = jnp.clip(adj.sum(axis=0), 1.0, None)
        deg_dst = jnp.clip(adj.sum(axis=1), 1.0, None)

        # Fold D_dst^{-1/2} into A rows and D_src^{-1/2} into the cheap transform.
        a_scaled = adj * (deg_dst[:, None] ** -0.5)
        x_scaled = inputs[stype] * (deg_src[:, None] ** -0.5)
        xw = jnp.dot(x_scaled, weights[etype],
                     precision=lax.Precision.HIGHEST)           # [ns_r, fout]

        a_blocks.append(
            jnp.pad(a_scaled, ((0, nd_pad - nd), (0, ns_pad_r - ns_r)))
            .astype(jnp.bfloat16))
        xw_blocks.append(
            jnp.pad(xw, ((0, ns_pad_r - ns_r), (0, fout_pad - fout)))
            .astype(jnp.bfloat16))

    a_cat = jnp.concatenate(a_blocks, axis=1)                   # [nd_pad, K_total]
    xw_cat = jnp.concatenate(xw_blocks, axis=0)                 # [K_total, fout_pad]
    return a_cat, xw_cat, tile_nd, nd, fout


def _group_by_dst(canonical_etypes, inputs):
    per_dst = {}
    for stype, etype, dtype in canonical_etypes:
        if stype not in inputs:
            continue
        per_dst.setdefault(dtype, []).append((stype, etype))
    return per_dst


def my_hetero_graph_conv_forward(canonical_etypes, adjacencies, weights, inputs,
                                 xw_resident_bytes=XW_RESIDENT_BYTES):
    """Pallas-backed forward of MyHeteroGraphConv (aggregate='sum', no edge weights).

    canonical_etypes: list of (stype, etype, dtype)
    adjacencies: dict[etype] -> dense 0/1 adjacency [N_dst, N_src]
    weights:     dict[etype] -> [Fin, Fout] per-relation GraphConv weight
    inputs:      dict[ntype] -> [N, Fin]
    returns:     dict[ntype] -> [N, Fout] float32
    """
    # TODO(synk): cross-type aggregators 'max'/'min'/'mean'/'stack', use_edge_weight=True
    # and arbitrary per-relation sub-modules are not implemented; only the default
    # agg='sum' with GraphConv(norm='both', bias=False) is covered.
    rsts = {}
    for dtype, rels in _group_by_dst(canonical_etypes, inputs).items():
        a_cat, xw_cat, tile_nd, nd, fout = _prepare_dsttype(
            rels, adjacencies, weights, inputs, TILE_NS)
        k_total, fout_pad = xw_cat.shape
        xw_resident = bool(k_total * fout_pad * 2 <= xw_resident_bytes)
        xw_3d = xw_cat.reshape(k_total // TILE_NS, TILE_NS, fout_pad)
        out = _hetero_agg(a_cat, xw_3d, tile_nd, TILE_NS, xw_resident)
        rsts[dtype] = out[:nd, :fout]
    return rsts


# ---------------------------------------------------------------------------
# Pure-JAX reference (mirrors the PyTorch module semantics, agg='sum')
# ---------------------------------------------------------------------------

def _graphconv_normalize(adj):
    deg_dst = jnp.clip(adj.sum(axis=1), 1.0, None)
    deg_src = jnp.clip(adj.sum(axis=0), 1.0, None)
    return adj * (deg_dst[:, None] ** -0.5) * (deg_src[None, :] ** -0.5)


def reference_forward(canonical_etypes, adjacencies, weights, inputs):
    outputs = {}
    for stype, etype, dtype in canonical_etypes:
        if stype not in inputs:
            continue
        a_hat = _graphconv_normalize(adjacencies[etype].astype(jnp.float32))
        xw = jnp.dot(inputs[stype], weights[etype], precision=lax.Precision.HIGHEST)
        dst = jnp.dot(a_hat, xw, precision=lax.Precision.HIGHEST)
        outputs.setdefault(dtype, []).append(dst)
    return {k: jnp.sum(jnp.stack(v, axis=0), axis=0) for k, v in outputs.items()}


if __name__ == "__main__":
    key = jax.random.PRNGKey(0)

    # Small synthetic heterogeneous graph.  Node counts deliberately differ per
    # node type and are not tile multiples, to exercise padding, ragged relation
    # concatenation, multi-tile grids and multi-relation reduction.
    N_USER, N_ITEM = 192, 160
    F_IN, F_OUT = 64, 128
    canonical_etypes = [
        ("user", "follows", "user"),
        ("user", "buys", "item"),
        ("item", "bought_by", "user"),
    ]
    n_nodes = {"user": N_USER, "item": N_ITEM}

    k_adj, k_feat, k_w = jax.random.split(key, 3)

    # deterministic 0/1 adjacencies (dst rows, src cols)
    adjacencies = {}
    for i, (stype, etype, dtype) in enumerate(canonical_etypes):
        ka = jax.random.fold_in(k_adj, i)
        adjacencies[etype] = (
            jax.random.uniform(ka, (n_nodes[dtype], n_nodes[stype])) < 0.3
        ).astype(jnp.float32)

    # deterministic per-relation GraphConv weights [F_IN, F_OUT]
    weights = {}
    for i, (_, etype, _) in enumerate(canonical_etypes):
        kw = jax.random.fold_in(k_w, i)
        weights[etype] = jax.random.normal(kw, (F_IN, F_OUT), jnp.float32) * 0.1

    # deterministic input node features
    inputs = {
        "user": jax.random.normal(jax.random.fold_in(k_feat, 0),
                                  (N_USER, F_IN), jnp.float32),
        "item": jax.random.normal(jax.random.fold_in(k_feat, 1),
                                  (N_ITEM, F_IN), jnp.float32),
    }

    ref = reference_forward(canonical_etypes, adjacencies, weights, inputs)

    # Path 1: XW resident in VMEM (default for these sizes).
    out_res = my_hetero_graph_conv_forward(canonical_etypes, adjacencies, weights, inputs)
    out_res = {k: jax.block_until_ready(v) for k, v in out_res.items()}
    # Path 2: XW streamed per reduction step (fallback for large XW).
    out_str = my_hetero_graph_conv_forward(canonical_etypes, adjacencies, weights, inputs,
                                           xw_resident_bytes=0)
    out_str = {k: jax.block_until_ready(v) for k, v in out_str.items()}

    for nty in ref:
        for out in (out_res, out_str):
            assert out[nty].shape == ref[nty].shape, (nty, out[nty].shape, ref[nty].shape)
            # bf16 A/XW streams with f32 accumulation: expected error O(1e-3) abs.
            assert jnp.allclose(out[nty], ref[nty], atol=2e-2, rtol=2e-2), (
                nty, float(jnp.max(jnp.abs(out[nty] - ref[nty]))))

    print("KERNEL_OK")
</pallas_src>

<mosaic_0001>
module attributes {stable_mosaic.version = 11 : i64} {
  func.func @_agg_kernel_resident(%arg0: i32, %arg1: i32, %arg2: memref<96x256xbf16, #tpu.memory_space<vmem>>, %arg3: memref<2x256x128xbf16, #tpu.memory_space<vmem>>, %arg4: memref<96x128xf32, #tpu.memory_space<vmem>>) attributes {dimension_semantics = [#tpu.dimension_semantics<parallel>, #tpu.dimension_semantics<arbitrary>], iteration_bounds = array<i64: 2, 2>, scalar_prefetch = 0 : i64, scratch_operands = 0 : i64, tpu.core_type = #tpu.core_type<tc>, window_params = [{transform_indices = @transform_0, window_bounds = array<i64: 96, 256>}, {pipeline_mode = #tpu.pipeline_mode<synchronous>, transform_indices = @transform_1, window_bounds = array<i64: 2, 256, 128>}, {transform_indices = @transform_2, window_bounds = array<i64: 96, 128>}]} {
    %c0_i32 = arith.constant 0 : i32
    %0 = arith.cmpi eq, %arg1, %c0_i32 : i32
    %1 = arith.extui %0 : i1 to i32
    %c0_i32_0 = arith.constant 0 : i32
    %2 = arith.cmpi ne, %1, %c0_i32_0 : i32
    scf.if %2 {
      %cst_8 = arith.constant 0.000000e+00 : f32
      %11 = vector.broadcast %cst_8 : f32 to vector<96x128xf32>
      %c0_9 = arith.constant 0 : index
      %c0_10 = arith.constant 0 : index
      %12 = vector.load %arg4[%c0_9, %c0_10] : memref<96x128xf32, #tpu.memory_space<vmem>>, vector<96x128xf32>
      tpu.vector_store %arg4[%c0_9, %c0_10], %11 {strides = array<i32>} : memref<96x128xf32, #tpu.memory_space<vmem>>, vector<96x128xf32>,
    } else {
    }
    %c0 = arith.constant 0 : index
    %c0_1 = arith.constant 0 : index
    %3 = vector.load %arg4[%c0, %c0_1] : memref<96x128xf32, #tpu.memory_space<vmem>>, vector<96x128xf32>
    %c0_2 = arith.constant 0 : index
    %c0_3 = arith.constant 0 : index
    %4 = vector.load %arg2[%c0_2, %c0_3] : memref<96x256xbf16, #tpu.memory_space<vmem>>, vector<96x256xbf16>
    %5 = arith.index_cast %arg1 : i32 to index
    %c0_4 = arith.constant 0 : index
    %c0_5 = arith.constant 0 : index
    %6 = vector.load %arg3[%5, %c0_4, %c0_5] : memref<2x256x128xbf16, #tpu.memory_space<vmem>>, vector<1x256x128xbf16>
    %7 = vector.shape_cast %6 : vector<1x256x128xbf16> to vector<256x128xbf16>
    %cst = arith.constant dense<0.000000e+00> : vector<96x128xf32>
    %8 = tpu.matmul %4, %7, %cst {dimension_numbers = #tpu.dot_dimension_numbers<[1], [0], [0], [1], [0, 0, 1, 1], [], []>} : vector<96x256xbf16>, vector<256x128xbf16>, vector<96x128xf32> -> vector<96x128xf32>
    %9 = arith.addf %3, %8 : vector<96x128xf32>
    %c0_6 = arith.constant 0 : index
    %c0_7 = arith.constant 0 : index
    %10 = vector.load %arg4[%c0_6, %c0_7] : memref<96x128xf32, #tpu.memory_space<vmem>>, vector<96x128xf32>
    tpu.vector_store %arg4[%c0_6, %c0_7], %9 {strides = array<i32>} : memref<96x128xf32, #tpu.memory_space<vmem>>, vector<96x128xf32>,
    return
  }
  func.func @transform_0(%arg0: i32, %arg1: i32) -> (i32, i32) {
    %c0_i32 = arith.constant 0 : i32
    return %arg0, %arg1 : i32, i32
  }
  func.func @transform_1(%arg0: i32, %arg1: i32) -> (i32, i32, i32) {
    %c0_i32 = arith.constant 0 : i32
    %c0_i32_0 = arith.constant 0 : i32
    %c0_i32_1 = arith.constant 0 : i32
    %c0_i32_2 = arith.constant 0 : i32
    return %c0_i32, %c0_i32_0, %c0_i32_1 : i32, i32, i32
  }
  func.func @transform_2(%arg0: i32, %arg1: i32) -> (i32, i32) {
    %c0_i32 = arith.constant 0 : i32
    %c0_i32_0 = arith.constant 0 : i32
    return %arg0, %c0_i32 : i32, i32
  }
}

</mosaic_0001>

<bundles_post_ra>
// kernel: _hetero_agg.1
= control target key start
LH: loop header
LB: loop body
LE: loop exit
PB: predicated region body
PF: predicated region fallthrough
CT: control target
= control target key end

     0   :  { %s1473_s0 = inlined_call_operand.hbm [shape: bf16[192,512], index: 0, kind: input, shape index: {}]   ;;  %s1474_s1 = inlined_call_operand.hbm [shape: bf16[2,256,128], index: 1, kind: input, shape index: {}]   ;;  %s1475_s2 = inlined_call_operand.hbm [shape: f32[192,128], index: 2, kind: output, shape index: {}]  }
   0x1   :  { %1486 = sst [smem:[#allocation15_spill]] %s1474_s1 }
   0x2   :  { %7 = vsyncpa [#allocation3], 0 }
   0x3   :  { %9 = vsyncpa [#allocation3 + $0x1], 0 }
   0x4   :  { %10 = vsyncpa [#allocation6], 0 }
   0x5   :  { %11 = vsyncpa [#allocation4], 0 }
   0x6   :  { %13 = vsyncpa [#allocation4 + $0x1], 0  ;;  %s1132_s9 = smov 0   ;;  %s1134_s10 = smov 0  }
   0x7   :  { %s1136_s11 = smov 0   ;;  %s1138_s12 = smov 0  }
   0x8   :  { %s1140_s13 = smov 0   ;;  %s1142_s14 = smov 0  }
   0x9   :  { %s1144_s15 = smov 0   ;;  %s1146_s16 = smov 0  }
   0xa   :  { %s1148_s17 = smov 0   ;;  %s1150_s18 = smov 0  }
   0xb   :  { %s1152_s19 = smov 0  }
   0xc LB: > { %1487 = sst [smem:[#allocation11_spill]] %s1096_s17  ;;  %s647_s20 = sadd.s32 4294967295, %s1104_s19   ;;  %s1104_s19 = sphi %s1152_s19, %s19_s19   ;;  %s1100_s18 = sphi %s1150_s18, %s1519_s18   ;;  %s1096_s17 = sphi %s1148_s17, %s1510_s17   ;;  %s1092_s16 = sphi %s1146_s16, %s1518_s16   ;;  %s1088_s15 = sphi %s1144_s15, %s1509_s15   ;;  %s1084_s14 = sphi %s1142_s14, %s1517_s14   ;;  %s1080_s13 = sphi %s1140_s13, %s1516_s13   ;;  %s1076_s12 = sphi %s1138_s12, %s1515_s12   ;;  %s1072_s11 = sphi %s1136_s11, %s1514_s11   ;;  %s1068_s10 = sphi %s1134_s10, %s1513_s10   ;;  %s1064_s9 = sphi %s1132_s9, %s1512_s9  }
   0xd   : > { %s648_s21 = sadd.s32 4294967294, %s1104_s19   ;;  %p47_p0 = scmp.ne.s32.totalorder %s1084_s14, %s1080_s13 }
   0xe   : > { %p48_p1 = scmp.eq.s32.totalorder %s1104_s19, 0  ;;  %p53_p2 = scmp.ne.s32.totalorder %s1080_s13, %s1076_s12 }
   0xf   : > { %p1192_p3 = scmp.eq.s32.totalorder %s647_s20, 0  ;;  %p97_p5 = scmp.ne.s32.totalorder %s1072_s11, %s1068_s10 }
  0x10   : > { %p1197_p4 = por %p48_p1, %p47_p0  ;;  %p98_p7 = scmp.eq.s32.totalorder %s647_s20, 3 }
  0x11   : > { %s1488_s23 = scalar_select %p1192_p3, 1, 0 }
  0x12   : > { %p1205_p6 = por %p1192_p3, %p53_p2  ;;  %p103_p8 = scmp.ne.s32.totalorder %s1068_s10, %s1064_s9 }
  0x13   : > { %p104_p9 = scmp.eq.s32.totalorder %s648_s21, 3  ;;  %p1211_p10 = por %p98_p7, %p97_p5 }
  0x14   : > { %s1490_s26 = scalar_select %p1205_p6, 1, 0 }
  0x15   : > { %s1491_s27 = scalar_select %p1211_p10, 1, 0 }
  0x16   : > { %p649_p11 = scmp.ge.s32.totalorder %s1104_s19, 1  ;;  %p1216_p12 = por %p104_p9, %p103_p8 }
  0x17   : > { %p111_p13 = scmp.lt.s32.totalorder %s1104_s19, 5  ;;  %s1106_s30 = smov [#allocation5]  }
  0x18   : > { %s1492_s28 = scalar_select %p1216_p12, 1, 0 }
  0x19   : > { %p1221_p0 = pnand %p649_p11, %p111_p13  ;;  %s123_s3 = sshll.u32 %s1106_s30, 4  ;;  %s124_s3 = int_to_ptr.vmem [resolvable:$true] %s123_s3 }
  0x1a   : > { %1493 = sst [smem:[#allocation12_spill]] %s1492_s28  ;;  %p786_p2 = scmp.lt.s32.totalorder %s1104_s19, 4 }
  0x1b   : > { %s1494_s29 = scalar_select %p1221_p0, 1, 0 }
  0x1c   : > { %p773_p1 = pneg %p1221_p0  ;;  %p1236_p7 = pnand %p786_p2, %p1197_p4 }
  0x1d   : > { %s1497_s1 = sld [smem:[#allocation15_spill]] }
  0x1e   : > { %p1230_p5 = pnand %p773_p1, %p1192_p3 }
  0x1f   : > { %s1496_s5 = scalar_select %p1236_p7, 1, 0 }
  0x20   : > { %p922_p9 = pneg %p1230_p5 }
  0x23   : > { %s920_s8 = scalar_lea.hbm %s1497_s1, 4096 }
  0x24   : > { %p921_p8 = scmp.ne.s32.totalorder %s1497_s1, %s920_s8  ;;  %p927_p1 = scmp.lt.u32.totalorder %s920_s8, %s1497_s1 }
  0x26   : > { %p923_p11 = pnand %p922_p9, %p921_p8 }
  0x28   : > { %p924_p13 = pneg %p923_p11 }
  0x2a   : > { %p929_p4 = pnand %p927_p1, %p924_p13 }
  0x2c   : > { %932 = shalt.err (!%p929_p4)
}
  0x2d   : > { %s933_s25 = scalar_lea.vmem %s124_s3, 4096  ;;  %p941_p3 = scmp.lt.s32.totalorder %s124_s3, %s124_s3 }
  0x2e   : > { %p934_p2 = scmp.ne.s32.totalorder %s124_s3, %s933_s25  ;;  %p942_p6 = scmp.lt.s32.totalorder %s933_s25, %s933_s25 }
  0x30   : > { %p936_p12 = pnand %p934_p2, %p922_p9  ;;  %p943_p0 = por %p942_p6, %p941_p3 }
  0x32   : > { %p937_p10 = pneg %p936_p12 }
  0x34   : > { %p944_p7 = pnand %p943_p0, %p937_p10 }
  0x36   : > { %947 = shalt.err (!%p944_p7)
}
  0x37   : > { %s1107_s6 = smov 64   ;;  %s1108_s7 = smov 4  }
  0x38   : > { %776 = dma.hbm_to_vmem [thread:$0]  (!%p1230_p5), %s1497_s1, 4096, %s124_s3, [#allocation6], %s1107_s6, %s1107_s6, %s1108_s7  }
  0x39   : > { %s28_s20 = sadd.s32 1, %s1096_s17  ;;  %s31_s21 = sadd.s32 1, %s1100_s18 }
  0x3a   : > { %p29_p3 = scmp.ge.s32.totalorder %s28_s20, 2  ;;  %s137_s30 = sand.u32 1, %s1084_s14  }
  0x3b   : > { %s762_s25 = smul.u32 96, %s137_s30  ;;  %s652_s4 = sshll.u32 %s1096_s17, 1 }
  0x3c   : > { %s1521_s20 = smov (%p29_p3, %s28_s20), 0  ;;  %s1523_s21 = smov (!%p29_p3, %s31_s21), %s1100_s18 }
  0x3d   : > { %1498 = sst [smem:[#allocation13_spill]] %s1521_s20  ;;  %s36_s22 = ssub.s32 %s1096_s17, %s1521_s20 }
  0x3e   : > { %p33_p6 = scmp.ge.s32.totalorder %s1523_s21, 2  ;;  %s691_s24 = smul.u32 48, %s1100_s18 }
  0x3f   : > { %s141_s8 = scalar_lea.vmem [#allocation2], %s762_s25  ;;  %s1500_s25 = sadd.s32 1, %s1072_s11 }
  0x40   : > { %s151_s3 = sshll.u32 %s141_s8, 4  ;;  %s1525_s21 = smov (%p33_p6, %s1523_s21), 0  ;;  %s1268_s3 = int_to_ptr.vmem [resolvable:$true] %s151_s3 }
  0x41   : > { %1499 = sst [smem:[#allocation14_spill]] %s1525_s21  ;;  %s148_s6 = sadd.s32 %s691_s24, %s652_s4 }
  0x42   : > { %s35_s7 = ssub.s32 %s1100_s18, %s1525_s21  ;;  %s654_s12 = sshll.u32 %s148_s6, 6 }
  0x43   : > { %s37_s1 = sor.u32 %s36_s22, %s35_s7  ;;  %p85_p10 = scmp.eq.s32.totalorder %s35_s7, 0 }
  0x44   : > { %p38_p12 = scmp.eq.s32.totalorder %s37_s1, 0  ;;  %s1275_s17 = scalar_lea.hbm %s1473_s0, %s654_s12 }
  0x45   : > { %s1280_s8 = scalar_select %p85_p10, %s1072_s11, %s1500_s25  }
  0x46   : > { %s1501_s24 = sadd.s32 1, %s1084_s14  ;;  %s1287_s21 = scalar_lea.sflag [#allocation3], %s137_s30 }
  0x47   : > { %s1285_s4 = scalar_select %p38_p12, %s1084_s14, %s1501_s24  }
  0x48   : > { %s948_s22 = scalar_lea.hbm %s1275_s17, 1536  ;;  %p1502_p5 = scmp.ne.s32.totalorder %s1496_s5, 0 }
  0x49   : > { %p949_p0 = scmp.ne.s32.totalorder %s1275_s17, %s948_s22  ;;  %s953_s20 = scalar_lea.hbm %s1473_s0, 6144 }
  0x4a   : > { %p950_p7 = pneg %p1502_p5  ;;  %p954_p11 = scmp.lt.u32.totalorder %s1275_s17, %s1473_s0 }
  0x4b   : > { %p955_p13 = scmp.lt.u32.totalorder %s953_s20, %s948_s22  ;;  %p957_p4 = scmp.lt.u32.totalorder %s948_s22, %s1275_s17 }
  0x4c   : > { %p951_p8 = pnand %p950_p7, %p949_p0 }
  0x4d   : > { %p956_p1 = por %p955_p13, %p954_p11 }
  0x4e   : > { %p952_p9 = pneg %p951_p8 }
  0x4f   : > { %p958_p2 = por %p957_p4, %p956_p1 }
  0x51   : > { %p959_p3 = pnand %p958_p2, %p952_p9 }
  0x53   : > { %962 = shalt.err (!%p959_p3)
}
  0x54   : > { %s963_s30 = scalar_lea.vmem %s1268_s3, 1536  ;;  %s1109_s12 = smov [#allocation2]  }
  0x55   : > { %p964_p6 = scmp.ne.s32.totalorder %s1268_s3, %s963_s30  ;;  %s968_s25 = sshll.u32 %s1109_s12, 4  ;;  %s969_s25 = int_to_ptr.vmem [resolvable:$false] %s968_s25 }
  0x56   : > { %s970_s24 = scalar_lea.vmem %s969_s25, 3072  ;;  %p971_p0 = scmp.lt.s32.totalorder %s1268_s3, %s969_s25 }
  0x57   : > { %p966_p10 = pnand %p964_p6, %p950_p7  ;;  %p972_p8 = scmp.lt.s32.totalorder %s970_s24, %s963_s30 }
  0x59   : > { %p967_p12 = pneg %p966_p10  ;;  %p973_p11 = por %p972_p8, %p971_p0 }
  0x5b   : > { %p974_p13 = pnand %p973_p11, %p967_p12 }
  0x5d   : > { %977 = shalt.err (!%p974_p13)
}
  0x5e   : > { %s1110_s22 = smov 256   ;;  %s1111_s1 = smov 128  }
  0x5f   : > { %s1112_s28 = smov 8   ;;  %p1503_p7 = scmp.ne.s32.totalorder %s1494_s29, 0 }
  0x60   : > { %780 = dma.hbm_to_vmem [thread:$0]  (!%p1502_p5), %s1275_s17, 1536, %s1268_s3, %s1287_s21, %s1110_s22, %s1111_s1, %s1112_s28  }
  0x61   : > { %163 = sbr.rel (%p1503_p7) target bundleno = 403 (0x193), region = 28  ;;  %s165_s20 = sand.u32 (!%p1503_p7), 1, %s1080_s13  }
  0x62   : > { %s763_s6 = smul.u32 (!%p1503_p7), 96, %s165_s20  ;;  %s166_s7 = scalar_lea.sflag (!%p1503_p7), [#allocation3], %s165_s20 }
  0x63   : > { %p1504_p9 = scmp.ne.s32.totalorder (!%p1503_p7), %s1490_s26, 0 }
  0x64   : > { %s1318_s30 = scalar_lea.vmem (!%p1503_p7), [#allocation2], %s763_s6 }
  0x68   : > { %1051 = dma.done.wait (%p1504_p9), %s166_s7, 1536  }
  0x69   : > { %1053 = vsyncadd (%p1504_p9), %s166_s7, 4294965760  ;;  %p1505_p1 = scmp.ne.s32.totalorder %s1488_s23, 0 }
  0x6b   : > { %1055 = dma.done.wait (%p1505_p1), [#allocation6], 4096  }
  0x6c   : > { %1057 = vsyncadd (%p1505_p1), [#allocation6], 4294963200  ;;  %s191_s17 = sand.u32 1, %s1068_s10   ;;  %p657_p5 = scmp.ne.s32.totalorder %s1088_s15, 0 }
  0x6d   : > { %s764_s29 = smul.u32 96, %s191_s17  ;;  %v1113_v0 = vmov (!%p657_p5), 0.0  }
  0x6e   : > { %201 = sbr.rel (%p657_p5) target bundleno = 118 (0x76), region = 40 }
  0x6f   : > { %s1331_s5 = scalar_lea.vmem [#allocation7], %s764_s29 }
  0x70   : > { %202 = vst [vmem:[%s1331_s5] sm:$0xff] (!%p657_p5), %v1113_v0  ;;  %203 = vst [vmem:[%s1331_s5 + $0x8] sm:$0xff] (!%p657_p5), %v1113_v0 }
  0x71   : > { %204 = vst [vmem:[%s1331_s5 + $0x10] sm:$0xff] (!%p657_p5), %v1113_v0  ;;  %205 = vst [vmem:[%s1331_s5 + $0x18] sm:$0xff] (!%p657_p5), %v1113_v0 }
  0x72   : > { %206 = vst [vmem:[%s1331_s5 + $0x20] sm:$0xff] (!%p657_p5), %v1113_v0  ;;  %207 = vst [vmem:[%s1331_s5 + $0x28] sm:$0xff] (!%p657_p5), %v1113_v0 }
  0x73   : > { %208 = vst [vmem:[%s1331_s5 + $0x30] sm:$0xff] (!%p657_p5), %v1113_v0  ;;  %209 = vst [vmem:[%s1331_s5 + $0x38] sm:$0xff] (!%p657_p5), %v1113_v0 }
  0x74   : > { %210 = vst [vmem:[%s1331_s5 + $0x40] sm:$0xff] (!%p657_p5), %v1113_v0  ;;  %211 = vst [vmem:[%s1331_s5 + $0x48] sm:$0xff] (!%p657_p5), %v1113_v0 }
  0x75   : > { %212 = vst [vmem:[%s1331_s5 + $0x50] sm:$0xff] %v1113_v0  ;;  %213 = vst [vmem:[%s1331_s5 + $0x58] sm:$0xff] %v1113_v0 }
  0x76 PF: > { %s692_s23 = sshll.u32 %s1088_s15, 7  ;;  %v904_v1 = vld [vmem:[%s1318_s30 + $0x4] ss:$8 sps:$4 sm:$0xff]   ;;  %v907_v13 = vld [vmem:[%s1318_s30 + $0x34] ss:$8 sps:$4 sm:$0xff]   ;;  %s693_s15 = smul.u32 1536, %s1092_s16 }
  0x77   : > { %s1348_s26 = scalar_lea.vmem [#allocation5], %s692_s23  ;;  %461 = vmatprep.mubr.bf16.mxu0 %v904_v1  ;;  %485 = vmatprep.mubr.bf16.mxu1 %v907_v13  ;;  %v902_v19 = vld [vmem:[%s1318_s30] ss:$8 sps:$4 sm:$0xff]   ;;  %v905_v20 = vld [vmem:[%s1318_s30 + $0x30] ss:$8 sps:$4 sm:$0xff]   ;;  %s548_s21 = sshll.u32 %s1331_s5, 4  ;;  %s1404_s21 = int_to_ptr.vmem [resolvable:$true] %s548_s21 }
  0x78   : > { %v886_v2 = vld [vmem:[%s1348_s26 + $0x40] sm:$0xff]   ;;  %v888_v4 = vld [vmem:[%s1348_s26 + $0x48] sm:$0xff]   ;;  %v890_v6 = vld [vmem:[%s1348_s26 + $0x50] sm:$0xff]   ;;  %s1402_s12 = scalar_lea.hbm %s1475_s2, %s693_s15  ;;  %s1412_s25 = scalar_lea.sflag [#allocation4], %s191_s17 }
  0x79   : > { %v887_v3 = vld [vmem:[%s1348_s26] sm:$0xff]   ;;  %694 = vmatprep.subr.bf16.mxu0 %v886_v2  ;;  %746 = vmatprep.subr.bf16.mxu1 %v886_v2  ;;  %v889_v5 = vld [vmem:[%s1348_s26 + $0x8] sm:$0xff]   ;;  %v891_v7 = vld [vmem:[%s1348_s26 + $0x10] sm:$0xff]   ;;  %s978_s24 = scalar_lea.vmem %s1404_s21, 1536  ;;  %p1506_p2 = scmp.ne.s32.totalorder %s1491_s27, 0 }
  0x7a   : > { %695 = vmatpush3.bf16.msra.mxu0 %v887_v3  ;;  %754 = vmatpush3.bf16.msra.mxu1 %v887_v3  ;;  %v892_v8 = vld [vmem:[%s1348_s26 + $0x58] sm:$0xff]   ;;  %v894_v10 = vld [vmem:[%s1348_s26 + $0x60] sm:$0xff]   ;;  %v896_v12 = vld [vmem:[%s1348_s26 + $0x68] sm:$0xff]   ;;  %p979_p4 = scmp.ne.s32.totalorder %s1404_s21, %s978_s24  ;;  %s1114_s22 = smov [#allocation7]  }
  0x7b   : > { %696 = vmatprep.subr.bf16.mxu0 %v888_v4  ;;  %747 = vmatprep.subr.bf16.mxu1 %v888_v4  ;;  %v893_v9 = vld [vmem:[%s1348_s26 + $0x18] sm:$0xff]   ;;  %v895_v11 = vld [vmem:[%s1348_s26 + $0x20] sm:$0xff]   ;;  %v897_v14 = vld [vmem:[%s1348_s26 + $0x28] sm:$0xff]   ;;  %s982_s1 = sshll.u32 %s1114_s22, 4  ;;  %s983_s1 = int_to_ptr.vmem [resolvable:$false] %s982_s1 }
  0x7c   : > { %v898_v15 = vld [vmem:[%s1348_s26 + $0x70] sm:$0xff]   ;;  %v900_v17 = vld [vmem:[%s1348_s26 + $0x78] sm:$0xff]   ;;  %v910_v22 = vld [vmem:[%s1318_s30 + $0x44] ss:$8 sps:$4 sm:$0xff]   ;;  %p980_p3 = pnand %p979_p4, %p1506_p2  ;;  %s984_s28 = scalar_lea.vmem %s983_s1, 3072 }
  0x7d   : > { %v899_v16 = vld [vmem:[%s1348_s26 + $0x30] sm:$0xff]   ;;  %v901_v18 = vld [vmem:[%s1348_s26 + $0x38] sm:$0xff]   ;;  %v913_v24 = vld [vmem:[%s1318_s30 + $0x40] ss:$8 sps:$4 sm:$0xff]   ;;  %p985_p10 = scmp.lt.s32.totalorder %s1404_s21, %s983_s1  ;;  %p986_p12 = scmp.lt.s32.totalorder %s984_s28, %s978_s24 }
  0x7e   : > { %697 = vmatpush3.bf16.msra.mxu0 %v889_v5  ;;  %755 = vmatpush3.bf16.msra.mxu1 %v889_v5  ;;  %v908_v21 = vld [vmem:[%s1318_s30 + $0x14] ss:$8 sps:$4 sm:$0xff]   ;;  %v912_v23 = vld [vmem:[%s1318_s30 + $0x10] ss:$8 sps:$4 sm:$0xff]   ;;  %v914_v25 = vld [vmem:[%s1318_s30 + $0x24] ss:$8 sps:$4 sm:$0xff]   ;;  %p981_p6 = pneg %p980_p3 }
  0x7f   : > { %698 = vmatprep.subr.bf16.mxu0 %v890_v6  ;;  %748 = vmatprep.subr.bf16.mxu1 %v890_v6  ;;  %v916_v26 = vld [vmem:[%s1318_s30 + $0x54] ss:$8 sps:$4 sm:$0xff]   ;;  %v918_v27 = vld [vmem:[%s1318_s30 + $0x20] ss:$8 sps:$4 sm:$0xff]   ;;  %v919_v28 = vld [vmem:[%s1318_s30 + $0x50] ss:$8 sps:$4 sm:$0xff]   ;;  %p987_p0 = por %p986_p12, %p985_p10 }
  0x80   : > { %v214_v31 = vld [vmem:[%s1331_s5] sm:$0xff]  ;;  %v220_v33 = vld [vmem:[%s1331_s5 + $0x30] sm:$0xff]  ;;  %v215_v39 = vld [vmem:[%s1331_s5 + $0x8] sm:$0xff] }
  0x81   : > { %v221_v41 = vld [vmem:[%s1331_s5 + $0x38] sm:$0xff]  ;;  %v216_v51 = vld [vmem:[%s1331_s5 + $0x10] sm:$0xff]  ;;  %v222_v53 = vld [vmem:[%s1331_s5 + $0x40] sm:$0xff]  ;;  %p988_p8 = pnand %p987_p0, %p981_p6 }
  0x82   : > { %699 = vmatpush3.bf16.msra.mxu0 %v891_v7  ;;  %756 = vmatpush3.bf16.msra.mxu1 %v891_v7  ;;  %v217_v59 = vld [vmem:[%s1331_s5 + $0x18] sm:$0xff]  ;;  %v223_v61 = vld [vmem:[%s1331_s5 + $0x48] sm:$0xff]  ;;  %v218_v7 = vld [vmem:[%s1331_s5 + $0x20] sm:$0xff] }
  0x83   : > { %700 = vmatprep.subr.bf16.mxu0 %v892_v8  ;;  %749 = vmatprep.subr.bf16.mxu1 %v892_v8 }
  0x86   : > { %701 = vmatpush3.bf16.msra.mxu0 %v893_v9  ;;  %757 = vmatpush3.bf16.msra.mxu1 %v893_v9  ;;  %v224_v9 = vld [vmem:[%s1331_s5 + $0x50] sm:$0xff] }
  0x87   : > { %702 = vmatprep.subr.bf16.mxu0 %v894_v10  ;;  %750 = vmatprep.subr.bf16.mxu1 %v894_v10 }
  0x8a   : > { %703 = vmatpush3.bf16.msra.mxu0 %v895_v11  ;;  %758 = vmatpush3.bf16.msra.mxu1 %v895_v11 }
  0x8b   : > { %704 = vmatprep.subr.bf16.mxu0 %v896_v12  ;;  %751 = vmatprep.subr.bf16.mxu1 %v896_v12 }
  0x8e   : > { %705 = vmatpush3.bf16.msra.mxu0 %v897_v14  ;;  %759 = vmatpush3.bf16.msra.mxu1 %v897_v14 }
  0x8f   : > { %706 = vmatprep.subr.bf16.mxu0 %v898_v15  ;;  %752 = vmatprep.subr.bf16.mxu1 %v898_v15  ;;  %v219_v15 = vld [vmem:[%s1331_s5 + $0x28] sm:$0xff] }
  0x92   : > { %707 = vmatpush3.bf16.msra.mxu0 %v899_v16  ;;  %760 = vmatpush3.bf16.msra.mxu1 %v899_v16 }
  0x93   : > { %708 = vmatprep.subr.bf16.mxu0 %v900_v17  ;;  %753 = vmatprep.subr.bf16.mxu1 %v900_v17  ;;  %v225_v17 = vld [vmem:[%s1331_s5 + $0x58] sm:$0xff] }
  0x96   : > { %709 = vmatpush3.bf16.msra.mxu0 %v901_v18  ;;  %761 = vmatpush3.bf16.msra.mxu1 %v901_v18 }
  0x99   : > { %462 = vmatmul.mubr.bf16.vlgmr.msra.gmra.mrb[0].mxu0 %v902_v19  ;;  %486 = vmatmul.mubr.bf16.vlgmr.msra.gmra.mrb[0].mxu1 %v905_v20 }
  0x9a   : > { %469 = vmatprep.mubr.bf16.mxu0 %v908_v21  ;;  %493 = vmatprep.mubr.bf16.mxu1 %v910_v22 }
  0xa1   : > { %470 = vmatmul.mubr.bf16.gmra.mrb[4].mxu0 %v912_v23  ;;  %494 = vmatmul.mubr.bf16.gmra.mrb[4].mxu1 %v913_v24 }
  0xa2   : > { %477 = vmatprep.mubr.bf16.mxu0 %v914_v25  ;;  %501 = vmatprep.mubr.bf16.mxu1 %v916_v26 }
  0xa9   : > { %478 = vmatmul.mubr.bf16.gmra.mrb[8].mxu0 %v918_v27  ;;  %502 = vmatmul.mubr.bf16.gmra.mrb[8].mxu1 %v919_v28 }
 0x16c   : > { %v710_v29 = vpop.f32.mrb[0].mxu0  ;;  %v728_v30 = vpop.f32.mrb[0].mxu1 }
 0x16d   : > { %v711_v32 = vpop.f32.mrb[1].mxu0  ;;  %v729_v34 = vpop.f32.mrb[1].mxu1 }
 0x16e   : > { %v712_v35 = vadd.f32 %v711_v32, %v710_v29  ;;  %v730_v36 = vadd.f32 %v729_v34, %v728_v30  ;;  %v713_v37 = vpop.f32.mrb[2].mxu0  ;;  %v731_v38 = vpop.f32.mrb[2].mxu1 }
 0x16f   : > { %v714_v40 = vpop.f32.mrb[3].mxu0  ;;  %v732_v42 = vpop.f32.mrb[3].mxu1 }
 0x170   : > { %v510_v43 = vadd.f32 %v712_v35, %v214_v31  ;;  %v516_v44 = vadd.f32 %v730_v36, %v220_v33  ;;  %v715_v45 = vadd.f32 %v714_v40, %v713_v37  ;;  %v733_v46 = vadd.f32 %v732_v42, %v731_v38 }
 0x172   : > { %522 = vst [vmem:[%s1331_s5] sm:$0xff] %v510_v43  ;;  %528 = vst [vmem:[%s1331_s5 + $0x30] sm:$0xff] %v516_v44  ;;  %v511_v47 = vadd.f32 %v715_v45, %v215_v39  ;;  %v517_v48 = vadd.f32 %v733_v46, %v221_v41 }
 0x174   : > { %523 = vst [vmem:[%s1331_s5 + $0x8] sm:$0xff] %v511_v47  ;;  %529 = vst [vmem:[%s1331_s5 + $0x38] sm:$0xff] %v517_v48  ;;  %v716_v49 = vpop.f32.mrb[4].mxu0  ;;  %v734_v50 = vpop.f32.mrb[4].mxu1 }
 0x175   : > { %v717_v52 = vpop.f32.mrb[5].mxu0  ;;  %v735_v54 = vpop.f32.mrb[5].mxu1 }
 0x176   : > { %v718_v55 = vadd.f32 %v717_v52, %v716_v49  ;;  %v736_v56 = vadd.f32 %v735_v54, %v734_v50  ;;  %v719_v57 = vpop.f32.mrb[6].mxu0  ;;  %v737_v58 = vpop.f32.mrb[6].mxu1 }
 0x177   : > { %v720_v60 = vpop.f32.mrb[7].mxu0  ;;  %v738_v62 = vpop.f32.mrb[7].mxu1 }
 0x178   : > { %v512_v63 = vadd.f32 %v718_v55, %v216_v51  ;;  %v518_v0 = vadd.f32 %v736_v56, %v222_v53  ;;  %v721_v1 = vadd.f32 %v720_v60, %v719_v57  ;;  %v739_v2 = vadd.f32 %v738_v62, %v737_v58 }
 0x17a   : > { %524 = vst [vmem:[%s1331_s5 + $0x10] sm:$0xff] %v512_v63  ;;  %530 = vst [vmem:[%s1331_s5 + $0x40] sm:$0xff] %v518_v0  ;;  %v513_v3 = vadd.f32 %v721_v1, %v217_v59  ;;  %v519_v4 = vadd.f32 %v739_v2, %v223_v61 }
 0x17c   : > { %525 = vst [vmem:[%s1331_s5 + $0x18] sm:$0xff] %v513_v3  ;;  %531 = vst [vmem:[%s1331_s5 + $0x48] sm:$0xff] %v519_v4  ;;  %v722_v5 = vpop.f32.mrb[8].mxu0  ;;  %v740_v6 = vpop.f32.mrb[8].mxu1 }
 0x17d   : > { %v723_v8 = vpop.f32.mrb[9].mxu0  ;;  %v741_v10 = vpop.f32.mrb[9].mxu1 }
 0x17e   : > { %v724_v11 = vadd.f32 %v723_v8, %v722_v5  ;;  %v742_v12 = vadd.f32 %v741_v10, %v740_v6  ;;  %v725_v13 = vpop.f32.mrb[10].mxu0  ;;  %v743_v14 = vpop.f32.mrb[10].mxu1 }
 0x17f   : > { %v726_v16 = vpop.f32.mrb[11].mxu0  ;;  %v744_v18 = vpop.f32.mrb[11].mxu1 }
 0x180   : > { %v514_v19 = vadd.f32 %v724_v11, %v218_v7  ;;  %v520_v20 = vadd.f32 %v742_v12, %v224_v9  ;;  %v727_v21 = vadd.f32 %v726_v16, %v725_v13  ;;  %v745_v22 = vadd.f32 %v744_v18, %v743_v14 }
 0x182   : > { %526 = vst [vmem:[%s1331_s5 + $0x20] sm:$0xff] %v514_v19  ;;  %532 = vst [vmem:[%s1331_s5 + $0x50] sm:$0xff] %v520_v20  ;;  %v515_v23 = vadd.f32 %v727_v21, %v219_v15  ;;  %v521_v24 = vadd.f32 %v745_v22, %v225_v17 }
 0x184   : > { %527 = vst [vmem:[%s1331_s5 + $0x28] sm:$0xff] %v515_v23  ;;  %533 = vst [vmem:[%s1331_s5 + $0x58] sm:$0xff] %v521_v24 }
 0x185   : > { %991 = shalt.err (!%p988_p8)
}
 0x186   : > { %s992_s20 = scalar_lea.hbm %s1402_s12, 1536  ;;  %s996_s30 = scalar_lea.hbm %s1475_s2, 3072 }
 0x187   : > { %p993_p11 = scmp.ne.s32.totalorder %s1402_s12, %s992_s20  ;;  %p997_p9 = scmp.lt.u32.totalorder %s1402_s12, %s1475_s2 }
 0x188   : > { %p998_p1 = scmp.lt.u32.totalorder %s996_s30, %s992_s20  ;;  %p1000_p4 = scmp.lt.u32.totalorder %s992_s20, %s1402_s12 }
 0x189   : > { %p994_p13 = pnand %p993_p11, %p1506_p2 }
 0x18a   : > { %p999_p5 = por %p998_p1, %p997_p9 }
 0x18b   : > { %p995_p7 = pneg %p994_p13 }
 0x18c   : > { %p1001_p3 = por %p1000_p4, %p999_p5 }
 0x18e   : > { %p1002_p6 = pnand %p1001_p3, %p995_p7 }
 0x190   : > { %1005 = shalt.err (!%p1002_p6)
}
 0x191   : > { %s1115_s5 = smov 128   ;;  %s1116_s23 = smov 8  }
 0x192   : > { %771 = dma.vmem_to_hbm [thread:$0]  (%p1506_p2), %s1404_s21, 1536, %s1402_s12, %s1412_s25, %s1115_s5, %s1115_s5, %s1116_s23  }
 0x193 PF: > { %s1507_s26 = sld [smem:[#allocation12_spill]]  ;;  %p788_p10 = scmp.ge.s32.totalorder %s1104_s19, 2 }
 0x194   : > { %s563_s15 = sand.u32 1, %s1064_s9  }
 0x195   : > { %s564_s16 = scalar_lea.sflag [#allocation4], %s563_s15 }
 0x199   : > { %p1508_p12 = scmp.ne.s32.totalorder %s1507_s26, 0 }
 0x19b   : > { %p782_p0 = pnand %p788_p10, %p1508_p12 }
 0x19d   : > { %1059 = dma.done.wait (!%p782_p0), %s564_s16, 1536  }
 0x19e   : > { %1061 = vsyncadd (!%p782_p0), %s564_s16, 4294965760  ;;  %s19_s19 = sadd.s32 1, %s1104_s19   ;;  %s1509_s15 = sld [smem:[#allocation11_spill]] }
 0x19f   : > { %p16_p8 = scmp.ge.s32.totalorder %s19_s19, 6   ;;  %s1510_s17 = sld [smem:[#allocation13_spill]] }
 0x1a0   : > { %s1511_s27 = sld [smem:[#allocation14_spill]]  ;;  %s1512_s9 = smov %s1068_s10 }
 0x1a1   : > { %s1513_s10 = smov %s1072_s11  ;;  %s1514_s11 = smov %s1280_s8 }
 0x1a2   : > { %s1515_s12 = smov %s1080_s13  ;;  %s1516_s13 = smov %s1084_s14 }
 0x1a3   : > { %s1517_s14 = smov %s1285_s4  ;;  %s1518_s16 = smov %s1100_s18 }
 0x1a4   :  { %18 = sbr.rel (!%p16_p8) target bundleno = 12 (0xc), region = 82 }
 0x1a6   : > { %s1519_s18 = smov %s1511_s27 }
 0x1ab   :  { %569 = vsyncpa [#allocation3], 1 }
 0x1ac   :  { %571 = vsyncpa [#allocation3 + $0x1], 1 }
 0x1ad   :  { %572 = vsyncpa [#allocation6], 1 }
 0x1ae   :  { %573 = vsyncpa [#allocation4], 1 }
 0x1af   :  { %575 = vsyncpa [#allocation4 + $0x1], 1 }

</bundles_post_ra>
